<compile_context>
chip_gen: v7x
topology: tpu7x:2x2x1
jax: 0.10.0
libtpu: 0.0.40
codegen_flags: <defaults>
</compile_context>

<pallas_src>
import math

import jax
import jax.numpy as jnp
from jax.experimental import pallas as pl
from jax.experimental.pallas import tpu as pltpu


_LRELU_SLOPE = 0.01


def _round_up(x, m):
    return ((x + m - 1) // m) * m


def _nbytes(a):
    return int(a.size) * a.dtype.itemsize


def netfighter_kernel(obs_ref, w1_ref, b1_ref, w2_ref, b2_ref, w3_ref, b3_ref,
                      out_ref):
    """Fused 3-layer MLP with LeakyReLU(0.01) on the first two layers.

    All math in f32 (weights are tiny and VMEM-resident); MXU accumulation
    in f32 via preferred_element_type. LeakyReLU as max(h, 0.01*h).
    """
    slope = jnp.float32(_LRELU_SLOPE)

    # obs may be f32 (default) or bf16 if the producer already stores it that
    # way; upcast once so the elementwise math stays f32.
    x = obs_ref[...].astype(jnp.float32)

    # Layer 1: [TM, S] @ [S, 64] + [1, 64]
    h1 = jnp.dot(x, w1_ref[...], preferred_element_type=jnp.float32) + b1_ref[...]
    h1 = jnp.maximum(h1, slope * h1)

    # Layer 2: [TM, 64] @ [64, 32] + [1, 32]
    h2 = jnp.dot(h1, w2_ref[...], preferred_element_type=jnp.float32) + b2_ref[...]
    h2 = jnp.maximum(h2, slope * h2)

    # Layer 3 (no activation): [TM, 32] @ [32, A] + [1, A]
    out = jnp.dot(h2, w3_ref[...], preferred_element_type=jnp.float32) + b3_ref[...]
    out_ref[...] = out.astype(out_ref.dtype)


def netfighter_forward(obs, params, *, block_m=4096, out_dtype=jnp.float32):
    """obs: [B, n_states]. params: dict of [in,out] f32 weights, [1,out] f32
    biases. Returns [B, n_actions] in out_dtype (default f32)."""
    b, n_states = obs.shape
    n_actions = params["w3_t"].shape[1]

    # ---- Batch tiling -------------------------------------------------------
    # Pick the biggest sublane-aligned tile up to block_m (fewer grid steps ->
    # less per-step overhead), but make sure the grid has >= 2 steps whenever
    # the batch allows so the "parallel" axis shards across both TCs on v7x.
    rows8 = _round_up(b, 8)
    tm = min(_round_up(block_m, 8), rows8)
    if rows8 > 8 and pl.cdiv(b, tm) < 2:
        tm = _round_up(pl.cdiv(rows8, 2), 8)
    grid = (pl.cdiv(b, tm),)

    # ---- VMEM budget --------------------------------------------------------
    weights_bytes = sum(_nbytes(a) for a in (
        params["w1_t"], params["b1"], params["w2_t"], params["b2"],
        params["w3_t"], params["b3"]))
    out_itemsize = jnp.dtype(out_dtype).itemsize
    tile_bytes = 2 * tm * (n_states * obs.dtype.itemsize
                           + n_actions * out_itemsize)      # double-buffered
    vmem_limit = int(min(48 * 1024 * 1024,                  # v7x-safe cap
                         max(32 * 1024 * 1024,
                             2 * (tile_bytes + 2 * weights_bytes))))

    vmem = pltpu.MemorySpace.VMEM

    def row_map(i):       # obs / out tiles walk the batch dimension
        return (i, 0)

    def resident_map(i):  # weights & biases: same full block every step
        return (0, 0)

    in_specs = [
        pl.BlockSpec((tm, n_states), row_map, memory_space=vmem),
        pl.BlockSpec(params["w1_t"].shape, resident_map, memory_space=vmem),
        pl.BlockSpec(params["b1"].shape, resident_map, memory_space=vmem),
        pl.BlockSpec(params["w2_t"].shape, resident_map, memory_space=vmem),
        pl.BlockSpec(params["b2"].shape, resident_map, memory_space=vmem),
        pl.BlockSpec(params["w3_t"].shape, resident_map, memory_space=vmem),
        pl.BlockSpec(params["b3"].shape, resident_map, memory_space=vmem),
    ]
    # Native-width output block (last dim == full array dim is legal); the
    # ragged last batch tile is masked on write by Pallas block padding.
    out_spec = pl.BlockSpec((tm, n_actions), row_map, memory_space=vmem)

    return pl.pallas_call(
        netfighter_kernel,
        out_shape=jax.ShapeDtypeStruct((b, n_actions), out_dtype),
        grid_spec=pltpu.PrefetchScalarGridSpec(
            num_scalar_prefetch=0,
            grid=grid,
            in_specs=in_specs,
            out_specs=out_spec,
        ),
        compiler_params=pltpu.CompilerParams(
            dimension_semantics=("parallel",),
            vmem_limit_bytes=vmem_limit,
        ),
    )(
        obs,
        params["w1_t"], params["b1"],
        params["w2_t"], params["b2"],
        params["w3_t"], params["b3"],
    )


def init_params(key, n_states, n_actions):
    """Mirror nn.Linear default init U(-1/sqrt(fan_in), +1/sqrt(fan_in)),
    then NetFighter.reset_parameters(): weights (only) scaled by
    gain = calculate_gain('leaky_relu') = sqrt(2 / (1 + 0.01**2)).
    Weights stored transposed ([in, out]) in f32; biases f32 [1, out]."""
    gain = math.sqrt(2.0 / (1.0 + _LRELU_SLOPE ** 2))

    def linear(k, fan_in, fan_out):
        kw, kb = jax.random.split(k)
        bound = 1.0 / math.sqrt(fan_in)
        w_t = jax.random.uniform(kw, (fan_in, fan_out), jnp.float32,
                                 minval=-bound, maxval=bound) * gain
        b = jax.random.uniform(kb, (1, fan_out), jnp.float32,
                               minval=-bound, maxval=bound)
        return w_t, b

    k1, k2, k3 = jax.random.split(key, 3)
    w1_t, b1 = linear(k1, n_states, 64)
    w2_t, b2 = linear(k2, 64, 32)
    w3_t, b3 = linear(k3, 32, n_actions)
    return dict(w1_t=w1_t, b1=b1, w2_t=w2_t, b2=b2, w3_t=w3_t, b3=b3)


def reference_forward(obs, p):
    """Plain-JAX f32 reference (matches PyTorch forward)."""
    def lrelu(x):
        return jnp.maximum(x, _LRELU_SLOPE * x)

    h1 = lrelu(jnp.dot(obs, p["w1_t"]) + p["b1"])
    h2 = lrelu(jnp.dot(h1, p["w2_t"]) + p["b2"])
    return jnp.dot(h2, p["w3_t"]) + p["b3"]


if __name__ == "__main__":
    key = jax.random.PRNGKey(0)
    kp, kx1, kx2 = jax.random.split(key, 3)

    n_states = 32
    n_actions = 16
    params = init_params(kp, n_states, n_actions)

    # Small batch (single grid step).
    obs_small = jax.random.normal(kx1, (8, n_states), jnp.float32)
    out_small = jax.block_until_ready(netfighter_forward(obs_small, params))
    ref_small = reference_forward(obs_small, params)
    assert out_small.shape == (8, n_actions)
    assert jnp.allclose(out_small, ref_small, atol=1e-2, rtol=1e-2), \
        "small-batch mismatch vs reference"

    # Larger batch with a ragged tail + multi-step grid (exercises masked
    # boundary tile and the >=2-step split for v7x megacore).
    obs_large = jax.random.normal(kx2, (200, n_states), jnp.float32)
    out_large = jax.block_until_ready(
        netfighter_forward(obs_large, params, block_m=64))
    ref_large = reference_forward(obs_large, params)
    assert out_large.shape == (200, n_actions)
    assert jnp.allclose(out_large, ref_large, atol=1e-2, rtol=1e-2), \
        "large-batch mismatch vs reference"

    print("KERNEL_OK")
</pallas_src>

<mosaic_0001>
module attributes {stable_mosaic.version = 11 : i64} {
  func.func @netfighter_kernel(%arg0: i32, %arg1: memref<8x32xf32, #tpu.memory_space<vmem>>, %arg2: memref<32x64xf32, #tpu.memory_space<vmem>>, %arg3: memref<1x64xf32, #tpu.memory_space<vmem>>, %arg4: memref<64x32xf32, #tpu.memory_space<vmem>>, %arg5: memref<1x32xf32, #tpu.memory_space<vmem>>, %arg6: memref<32x16xf32, #tpu.memory_space<vmem>>, %arg7: memref<1x16xf32, #tpu.memory_space<vmem>>, %arg8: memref<8x16xf32, #tpu.memory_space<vmem>>) attributes {dimension_semantics = [#tpu.dimension_semantics<parallel>], iteration_bounds = array<i64: 1>, scalar_prefetch = 0 : i64, scratch_operands = 0 : i64, tpu.core_type = #tpu.core_type<tc>, window_params = [{transform_indices = @transform_0, window_bounds = array<i64: 8, 32>}, {pipeline_mode = #tpu.pipeline_mode<synchronous>, transform_indices = @transform_1, window_bounds = array<i64: 32, 64>}, {pipeline_mode = #tpu.pipeline_mode<synchronous>, transform_indices = @transform_2, window_bounds = array<i64: 1, 64>}, {pipeline_mode = #tpu.pipeline_mode<synchronous>, transform_indices = @transform_3, window_bounds = array<i64: 64, 32>}, {pipeline_mode = #tpu.pipeline_mode<synchronous>, transform_indices = @transform_4, window_bounds = array<i64: 1, 32>}, {pipeline_mode = #tpu.pipeline_mode<synchronous>, transform_indices = @transform_5, window_bounds = array<i64: 32, 16>}, {pipeline_mode = #tpu.pipeline_mode<synchronous>, transform_indices = @transform_6, window_bounds = array<i64: 1, 16>}, {transform_indices = @transform_7, window_bounds = array<i64: 8, 16>}]} {
    %c0 = arith.constant 0 : index
    %c0_0 = arith.constant 0 : index
    %0 = vector.load %arg1[%c0, %c0_0] : memref<8x32xf32, #tpu.memory_space<vmem>>, vector<8x32xf32>
    %c0_1 = arith.constant 0 : index
    %c0_2 = arith.constant 0 : index
    %1 = vector.load %arg2[%c0_1, %c0_2] : memref<32x64xf32, #tpu.memory_space<vmem>>, vector<32x64xf32>
    %cst = arith.constant dense<0.000000e+00> : vector<8x64xf32>
    %2 = tpu.matmul %0, %1, %cst {dimension_numbers = #tpu.dot_dimension_numbers<[1], [0], [0], [1], [0, 0, 1, 1], [], []>} : vector<8x32xf32>, vector<32x64xf32>, vector<8x64xf32> -> vector<8x64xf32>
    %c0_3 = arith.constant 0 : index
    %c0_4 = arith.constant 0 : index
    %3 = vector.load %arg3[%c0_3, %c0_4] : memref<1x64xf32, #tpu.memory_space<vmem>>, vector<1x64xf32>
    %4 = vector.broadcast %3 : vector<1x64xf32> to vector<8x64xf32>
    %5 = arith.addf %2, %4 : vector<8x64xf32>
    %cst_5 = arith.constant 0.00999999977 : f32
    %6 = vector.broadcast %cst_5 : f32 to vector<8x64xf32>
    %7 = arith.mulf %6, %5 : vector<8x64xf32>
    %8 = arith.maximumf %5, %7 : vector<8x64xf32>
    %c0_6 = arith.constant 0 : index
    %c0_7 = arith.constant 0 : index
    %9 = vector.load %arg4[%c0_6, %c0_7] : memref<64x32xf32, #tpu.memory_space<vmem>>, vector<64x32xf32>
    %cst_8 = arith.constant dense<0.000000e+00> : vector<8x32xf32>
    %10 = tpu.matmul %8, %9, %cst_8 {dimension_numbers = #tpu.dot_dimension_numbers<[1], [0], [0], [1], [0, 0, 1, 1], [], []>} : vector<8x64xf32>, vector<64x32xf32>, vector<8x32xf32> -> vector<8x32xf32>
    %c0_9 = arith.constant 0 : index
    %c0_10 = arith.constant 0 : index
    %11 = vector.load %arg5[%c0_9, %c0_10] : memref<1x32xf32, #tpu.memory_space<vmem>>, vector<1x32xf32>
    %12 = vector.broadcast %11 : vector<1x32xf32> to vector<8x32xf32>
    %13 = arith.addf %10, %12 : vector<8x32xf32>
    %cst_11 = arith.constant 0.00999999977 : f32
    %14 = vector.broadcast %cst_11 : f32 to vector<8x32xf32>
    %15 = arith.mulf %14, %13 : vector<8x32xf32>
    %16 = arith.maximumf %13, %15 : vector<8x32xf32>
    %c0_12 = arith.constant 0 : index
    %c0_13 = arith.constant 0 : index
    %17 = vector.load %arg6[%c0_12, %c0_13] : memref<32x16xf32, #tpu.memory_space<vmem>>, vector<32x16xf32>
    %cst_14 = arith.constant dense<0.000000e+00> : vector<8x16xf32>
    %18 = tpu.matmul %16, %17, %cst_14 {dimension_numbers = #tpu.dot_dimension_numbers<[1], [0], [0], [1], [0, 0, 1, 1], [], []>} : vector<8x32xf32>, vector<32x16xf32>, vector<8x16xf32> -> vector<8x16xf32>
    %c0_15 = arith.constant 0 : index
    %c0_16 = arith.constant 0 : index
    %19 = vector.load %arg7[%c0_15, %c0_16] : memref<1x16xf32, #tpu.memory_space<vmem>>, vector<1x16xf32>
    %20 = vector.broadcast %19 : vector<1x16xf32> to vector<8x16xf32>
    %21 = arith.addf %18, %20 : vector<8x16xf32>
    %c0_17 = arith.constant 0 : index
    %c0_18 = arith.constant 0 : index
    %22 = vector.load %arg8[%c0_17, %c0_18] : memref<8x16xf32, #tpu.memory_space<vmem>>, vector<8x16xf32>
    tpu.vector_store %arg8[%c0_17, %c0_18], %21 {strides = array<i32>} : memref<8x16xf32, #tpu.memory_space<vmem>>, vector<8x16xf32>,
    return
  }
  func.func @transform_0(%arg0: i32) -> (i32, i32) {
    %c0_i32 = arith.constant 0 : i32
    %c0_i32_0 = arith.constant 0 : i32
    return %arg0, %c0_i32 : i32, i32
  }
  func.func @transform_1(%arg0: i32) -> (i32, i32) {
    %c0_i32 = arith.constant 0 : i32
    %c0_i32_0 = arith.constant 0 : i32
    %c0_i32_1 = arith.constant 0 : i32
    return %c0_i32, %c0_i32_0 : i32, i32
  }
  func.func @transform_2(%arg0: i32) -> (i32, i32) {
    %c0_i32 = arith.constant 0 : i32
    %c0_i32_0 = arith.constant 0 : i32
    %c0_i32_1 = arith.constant 0 : i32
    return %c0_i32, %c0_i32_0 : i32, i32
  }
  func.func @transform_3(%arg0: i32) -> (i32, i32) {
    %c0_i32 = arith.constant 0 : i32
    %c0_i32_0 = arith.constant 0 : i32
    %c0_i32_1 = arith.constant 0 : i32
    return %c0_i32, %c0_i32_0 : i32, i32
  }
  func.func @transform_4(%arg0: i32) -> (i32, i32) {
    %c0_i32 = arith.constant 0 : i32
    %c0_i32_0 = arith.constant 0 : i32
    %c0_i32_1 = arith.constant 0 : i32
    return %c0_i32, %c0_i32_0 : i32, i32
  }
  func.func @transform_5(%arg0: i32) -> (i32, i32) {
    %c0_i32 = arith.constant 0 : i32
    %c0_i32_0 = arith.constant 0 : i32
    %c0_i32_1 = arith.constant 0 : i32
    return %c0_i32, %c0_i32_0 : i32, i32
  }
  func.func @transform_6(%arg0: i32) -> (i32, i32) {
    %c0_i32 = arith.constant 0 : i32
    %c0_i32_0 = arith.constant 0 : i32
    %c0_i32_1 = arith.constant 0 : i32
    return %c0_i32, %c0_i32_0 : i32, i32
  }
  func.func @transform_7(%arg0: i32) -> (i32, i32) {
    %c0_i32 = arith.constant 0 : i32
    %c0_i32_0 = arith.constant 0 : i32
    return %arg0, %c0_i32 : i32, i32
  }
}

</mosaic_0001>

<bundles_post_ra>
// kernel: tpu_custom_call.1
= control target key start
LH: loop header
LB: loop body
LE: loop exit
PB: predicated region body
PF: predicated region fallthrough
CT: control target
= control target key end

     0   :  { %v424_v3 = vmov 0.0|0.0   ;;  %vm425_vm0 = vmmov 0   ;;  %v426_v6 = vmov 0.0   ;;  %s545_s0 = inlined_call_operand.vmem [shape: f32[8,32], index: 0, kind: input, shape index: {}]   ;;  %s546_s1 = inlined_call_operand.vmem [shape: f32[32,64], index: 1, kind: input, shape index: {}]   ;;  %s547_s2 = inlined_call_operand.vmem [shape: f32[1,64], index: 2, kind: input, shape index: {}]   ;;  %s548_s3 = inlined_call_operand.vmem [shape: f32[64,32], index: 3, kind: input, shape index: {}]   ;;  %s549_s4 = inlined_call_operand.vmem [shape: f32[1,32], index: 4, kind: input, shape index: {}]   ;;  %s550_s5 = inlined_call_operand.vmem [shape: f32[32,16], index: 5, kind: input, shape index: {}]   ;;  %s551_s6 = inlined_call_operand.vmem [shape: f32[1,16], index: 6, kind: input, shape index: {}]   ;;  %s552_s7 = inlined_call_operand.hbm [shape: f32[8,16], index: 7, kind: output, shape index: {}]  }
   0x1   :  { %v28_v0 = vld [vmem:[%s546_s1] sm:$0xff]  ;;  %v29_v1 = vld [vmem:[%s546_s1 + $0x8] sm:$0xff]  ;;  %v30_v2 = vld [vmem:[%s546_s1 + $0x10] sm:$0xff]  ;;  %372 = vmatprep.subr.bf16.mxu0 %v424_v3  ;;  %339 = vmatprep.mubr.msk.f32.mxu0 %vm425_vm0, %v426_v6 }
   0x2   :  { %v373_v4 = vpack.c.bf16 %v29_v1, %v28_v0  ;;  %v31_v5 = vld [vmem:[%s546_s1 + $0x18] sm:$0xff]  ;;  %v115_v7 = vld [vmem:[%s548_s3] sm:$0xff]  ;;  %378 = vmatprep.subr.bf16.mxu1 %v424_v3  ;;  %v116_v8 = vld [vmem:[%s548_s3 + $0x8] sm:$0xff]  ;;  %358 = vmatprep.mubr.msk.f32.mxu1 %vm425_vm0, %v426_v6 }
   0x3   :  { %v117_v9 = vld [vmem:[%s548_s3 + $0x10] sm:$0xff]  ;;  %v118_v10 = vld [vmem:[%s548_s3 + $0x18] sm:$0xff]  ;;  %v376_v11 = vpack.c.bf16 %v31_v5, %v30_v2  ;;  %v379_v12 = vpack.c.bf16 %v116_v8, %v115_v7 }
   0x4   :  { %374 = vmatpush3.bf16.msra.mxu0 %v373_v4 }
   0x5   :  { %12 = vsyncpa [#allocation3], 0  ;;  %375 = vmatprep.subr.bf16.mxu0 %v424_v3  ;;  %380 = vmatpush3.bf16.msra.mxu1 %v379_v12  ;;  %v382_v13 = vpack.c.bf16 %v118_v10, %v117_v9  ;;  %v27_v14 = vld [vmem:[%s545_s0] sm:$0xff]  ;;  %vm39_vm1 = vcmask 261120   ;;  %v120_v16 = vld [vmem:[%s548_s3 + $0x28] sm:$0xff]  ;;  %vm130_vm2 = vcmask 523264  }
   0x6   :  { %381 = vmatprep.subr.bf16.mxu1 %v424_v3  ;;  %v119_v15 = vld [vmem:[%s548_s3 + $0x20] sm:$0xff]  ;;  %v121_v18 = vld [vmem:[%s548_s3 + $0x30] sm:$0xff]  ;;  %v122_v19 = vld [vmem:[%s548_s3 + $0x38] sm:$0xff]  ;;  %s427_s14 = smov [#allocation2]   ;;  %vm290_vm3 = vcmask 130048  }
   0x7   :  { %v385_v17 = vpack.c.bf16 %v120_v16, %v119_v15  ;;  %v388_v20 = vpack.c.bf16 %v122_v19, %v121_v18  ;;  %v306_v21 = vld [vmem:[%s547_s2] ss:$0 sm:$0xff]  ;;  %v207_v28 = vld [vmem:[%s550_s5 + $0x8] sm:$0xff]  ;;  %v208_v30 = vld [vmem:[%s550_s5 + $0x10] sm:$0xff]  ;;  %s298_s15 = sshll.u32 %s427_s14, 4  ;;  %s299_s15 = int_to_ptr.vmem [resolvable:$true] %s298_s15 }
   0x8   :  { %377 = vmatpush3.bf16.msra.mxu0 %v376_v11  ;;  %v206_v27 = vld [vmem:[%s550_s5] sm:$0xff]  ;;  %v209_v31 = vld [vmem:[%s550_s5 + $0x18] sm:$0xff]  ;;  %p405_p1 = scmp.lt.s32.totalorder %s299_s15, %s299_s15 }
   0x9   :  { %390 = vmatprep.subr.bf16.mxu0 %v424_v3  ;;  %383 = vmatpush3.bf16.msra.mxu1 %v382_v13  ;;  %v391_v29 = vpack.c.bf16 %v207_v28, %v206_v27  ;;  %v394_v32 = vpack.c.bf16 %v209_v31, %v208_v30  ;;  %v308_v33 = vld [vmem:[%s549_s4] ss:$0 sm:$0xff]  ;;  %s400_s4 = scalar_lea.vmem %s299_s15, 128 }
   0xa   :  { %384 = vmatprep.subr.bf16.mxu1 %v424_v3  ;;  %v310_v39 = vld [vmem:[%s551_s6] ss:$0 sm:$0xff]  ;;  %p401_p0 = scmp.ne.s32.totalorder %s299_s15, %s400_s4  ;;  %p406_p2 = scmp.lt.s32.totalorder %s400_s4, %s400_s4 }
   0xb   :  { %340 = vmatmul.mubr.msk.f32.vlgmr.msra.gmra.mrb[0].mxu0 %vm39_vm1, %v27_v14 }
   0xc   :  { %369 = vmatprep.mubr.msk.f32.mxu0 %vm425_vm0, %v426_v6  ;;  %392 = vmatpush3.bf16.msra.mxu0 %v391_v29  ;;  %p407_p3 = por %p406_p2, %p405_p1 }
   0xd   :  { %386 = vmatpush3.bf16.msra.mxu1 %v385_v17  ;;  %393 = vmatprep.subr.bf16.mxu0 %v424_v3 }
   0xe   :  { %387 = vmatprep.subr.bf16.mxu1 %v424_v3  ;;  %p408_p4 = pnand %p407_p3, %p401_p0 }
  0x10   :  { %395 = vmatpush3.bf16.msra.mxu0 %v394_v32 }
  0x11   :  { %389 = vmatpush3.bf16.msra.mxu1 %v388_v20 }
  0xde   :  { %v109_v22 = vpop.f32.mrb[0].mxu0 }
  0xdf   :  { %v110_v23 = vadd.f32 %v306_v21, %v109_v22  ;;  %v341_v24 = vpop.f32.mrb[1].mxu0 }
  0xe1   :  { %v113_v25 = vmul.f32 0.01, %v110_v23 }
  0xe3   :  { %v114_v26 = vmax.f32 %v110_v23, %v113_v25 }
  0xe5   :  { %359 = vmatmul.mubr.msk.f32.vlgmr.msra.gmra.mrb[0].mxu1 %vm130_vm2, %v114_v26 }
 0x1b8   :  { %v200_v34 = vpop.f32.mrb[0].mxu1 }
 0x1b9   :  { %v201_v35 = vadd.f32 %v308_v33, %v200_v34  ;;  %v360_v36 = vpop.f32.mrb[1].mxu1 }
 0x1bb   :  { %v204_v37 = vmul.f32 0.01, %v201_v35 }
 0x1bd   :  { %v205_v38 = vmax.f32 %v201_v35, %v204_v37 }
 0x1bf   :  { %370 = vmatmul.mubr.msk.f32.vlgmr.msra.gmra.mrb[2].mxu0 %vm39_vm1, %v205_v38 }
 0x292   :  { %v286_v40 = vpop.f32.mrb[2].mxu0 }
 0x293   :  { %v287_v41 = vadd.f32 %v310_v39, %v286_v40  ;;  %v371_v42 = vpop.f32.mrb[3].mxu0 }
 0x295   :  { %291 = vst.msk [vmem:[#allocation2] sm:$0xff] %vm290_vm3, %v287_v41 }
 0x296   :  { %411 = shalt.err (!%p408_p4)
}
 0x297   :  { %s412_s1 = scalar_lea.hbm %s552_s7, 128 }
 0x298   :  { %p413_p5 = scmp.ne.s32.totalorder %s552_s7, %s412_s1  ;;  %p416_p6 = scmp.lt.u32.totalorder %s412_s1, %s552_s7 }
 0x29a   :  { %p418_p7 = pnand %p416_p6, %p413_p5 }
 0x29c   :  { %421 = shalt.err (!%p418_p7)
}
 0x29d   :  { %301 = dma.vmem_to_hbm [thread:$0]  %s299_s15, 128, %s552_s7, [#allocation3]  }
 0x29e   :  { %422 = dma.done.wait [#allocation3], 128  }
 0x29f   :  { %423 = vsyncadd [#allocation3], 4294967168 }
 0x2a0   :  { %305 = vsyncpa [#allocation3], 1 }

</bundles_post_ra>
